<compile_context>
chip_gen: v7x
topology: tpu7x:2x2x1
jax: 0.10.0
libtpu: 0.0.40
codegen_flags: <defaults>
</compile_context>

<pallas_src>
import functools

import jax
import jax.numpy as jnp
from jax.experimental import pallas as pl
from jax.experimental.pallas import tpu as pltpu


def _rnn_decoder_kernel(B, D,
                        idx_ref,     # SMEM (T*B_pad,) int32 token ids (prefetch)
                        emb_ref,     # VMEM (V, D)      f32 embedding table
                        h0_ref,      # VMEM (B_pad, D)  f32 initial hidden
                        wrz_ref,     # VMEM (2D, 2D)    bf16 [Wi_r|Wi_z ; Wh_r|Wh_z]
                        win_ref,     # VMEM (D, D)      bf16 Wi_n^T
                        whn_ref,     # VMEM (D, D)      bf16 Wh_n^T
                        brz_ref,     # VMEM (1, 2D)     f32  (b_i + b_h)[:2D]
                        bin_ref,     # VMEM (1, D)      f32  b_i[2D:]
                        bhn_ref,     # VMEM (1, D)      f32  b_h[2D:]
                        wout_ref,    # VMEM (D, V_pad)  bf16
                        bout_ref,    # VMEM (1, V_pad)  f32 (-1e30 in padded lanes)
                        out_ref,     # VMEM (1, B_pad, V_pad) f32 log-probs (this step)
                        hout_ref,    # VMEM (B_pad, D)  f32 final hidden
                        h_scr,       # VMEM scratch (B_pad, D)   f32 hidden carry
                        x_scr,       # VMEM scratch (B_pad, D)   f32 gathered embeddings
                        xh_scr):     # VMEM scratch (B_pad, 2D)  bf16 [x | h]
    t = pl.program_id(0)
    B_pad = h_scr.shape[0]

    @pl.when(t == 0)
    def _():
        h_scr[...] = h0_ref[...]
        x_scr[...] = jnp.zeros_like(x_scr)   # padded rows stay zero forever

    # --- embedding gather: in-VMEM dynamic row reads (table is tiny) ---
    for b in range(B):                       # B is a trace-time Python int
        tok = idx_ref[t * B_pad + b]
        x_scr[pl.ds(b, 1), :] = emb_ref[pl.ds(tok, 1), :]

    # --- F.relu before the GRU (n_layers == 1) ---
    x = jnp.maximum(x_scr[...], 0.0)         # (B_pad, D) f32
    h = h_scr[...]                           # (B_pad, D) f32

    # bf16 inputs to the MXU; everything else stays f32.
    xh_scr[:, :D] = x.astype(jnp.bfloat16)
    xh_scr[:, D:] = h.astype(jnp.bfloat16)

    # --- fused r/z gates: one (B,2D)x(2D,2D) matmul ---
    rz = jnp.dot(xh_scr[...], wrz_ref[...],
                 preferred_element_type=jnp.float32) + brz_ref[...]   # (B_pad, 2D)
    r = jax.nn.sigmoid(rz[:, :D])
    z = jax.nn.sigmoid(rz[:, D:])

    # --- n gate (needs r * gh_n, so x/h paths stay separate) ---
    gi_n = jnp.dot(x.astype(jnp.bfloat16), win_ref[...],
                   preferred_element_type=jnp.float32) + bin_ref[...]
    gh_n = jnp.dot(h.astype(jnp.bfloat16), whn_ref[...],
                   preferred_element_type=jnp.float32) + bhn_ref[...]
    n = jnp.tanh(gi_n + r * gh_n)
    h_new = (1.0 - z) * n + z * h            # (B_pad, D) f32

    # --- Linear + LogSoftmax(dim=1) ---
    # Padded vocab lanes carry a -1e30 f32 bias: they never win the max and
    # underflow to 0 in the sum, so no masking is needed.
    logits = jnp.dot(h_new.astype(jnp.bfloat16), wout_ref[...],
                     preferred_element_type=jnp.float32) + bout_ref[...]
    m = jnp.max(logits, axis=1, keepdims=True)
    lse = jnp.log(jnp.sum(jnp.exp(logits - m), axis=1, keepdims=True)) + m
    out_ref[0] = logits - lse

    # carry hidden to the next decode step; also expose the final hidden
    h_scr[...] = h_new
    hout_ref[...] = h_new


def _prep_params(params):
    """One-time transposes / gate splits / vocab padding / bf16 casts."""
    emb, w_ih, w_hh, b_ih, b_hh, w_out, b_out = params
    V, D = emb.shape
    V_pad = ((V + 127) // 128) * 128

    wih_t = jnp.asarray(w_ih, jnp.float32).T          # (D, 3D), cols = [r|z|n]
    whh_t = jnp.asarray(w_hh, jnp.float32).T
    b_ih = jnp.asarray(b_ih, jnp.float32)
    b_hh = jnp.asarray(b_hh, jnp.float32)

    # Fused r/z weight:  [x|h] @ W_rz  ==  x @ Wi_rz + h @ Wh_rz
    w_rz = jnp.concatenate([wih_t[:, :2 * D], whh_t[:, :2 * D]], axis=0)  # (2D, 2D)
    b_rz = (b_ih[:2 * D] + b_hh[:2 * D]).reshape(1, 2 * D)

    w_in = wih_t[:, 2 * D:]                           # (D, D)
    w_hn = whh_t[:, 2 * D:]
    b_in = b_ih[2 * D:].reshape(1, D)
    b_hn = b_hh[2 * D:].reshape(1, D)

    w_out_p = jnp.zeros((D, V_pad), jnp.float32).at[:, :V].set(
        jnp.asarray(w_out, jnp.float32).T)            # (D, V_pad)
    b_out_p = jnp.full((1, V_pad), -1e30, jnp.float32).at[0, :V].set(
        jnp.asarray(b_out, jnp.float32))              # (1, V_pad), keep f32!

    return dict(
        emb=jnp.asarray(emb, jnp.float32),
        w_rz=w_rz.astype(jnp.bfloat16),
        w_in=w_in.astype(jnp.bfloat16),
        w_hn=w_hn.astype(jnp.bfloat16),
        b_rz=b_rz, b_in=b_in, b_hn=b_hn,
        w_out=w_out_p.astype(jnp.bfloat16),
        b_out=b_out_p,
        V=V, D=D, V_pad=V_pad,
    )


def _make_call(prepped, B, B_pad, T):
    V, D, V_pad = prepped["V"], prepped["D"], prepped["V_pad"]
    const = lambda t, idx: (0, 0)   # weights / h0: same block every step -> VMEM-resident

    grid_spec = pltpu.PrefetchScalarGridSpec(
        num_scalar_prefetch=1,          # token ids -> SMEM, visible to index_maps
        grid=(T,),
        in_specs=[
            pl.BlockSpec((V, D), const),              # emb
            pl.BlockSpec((B_pad, D), const),          # h0
            pl.BlockSpec((2 * D, 2 * D), const),      # w_rz  (bf16)
            pl.BlockSpec((D, D), const),              # w_in  (bf16)
            pl.BlockSpec((D, D), const),              # w_hn  (bf16)
            pl.BlockSpec((1, 2 * D), const),          # b_rz
            pl.BlockSpec((1, D), const),              # b_in
            pl.BlockSpec((1, D), const),              # b_hn
            pl.BlockSpec((D, V_pad), const),          # w_out (bf16)
            pl.BlockSpec((1, V_pad), const),          # b_out (f32, -1e30 pad)
        ],
        out_specs=[
            pl.BlockSpec((1, B_pad, V_pad), lambda t, idx: (t, 0, 0)),  # per-step log-probs
            pl.BlockSpec((B_pad, D), const),                            # final hidden
        ],
        scratch_shapes=[
            pltpu.VMEM((B_pad, D), jnp.float32),          # hidden carry
            pltpu.VMEM((B_pad, D), jnp.float32),          # gathered embeddings
            pltpu.VMEM((B_pad, 2 * D), jnp.bfloat16),     # [x | h] for fused r/z matmul
        ],
    )

    return pl.pallas_call(
        functools.partial(_rnn_decoder_kernel, B, D),
        grid_spec=grid_spec,
        out_shape=(jax.ShapeDtypeStruct((T, B_pad, V_pad), jnp.float32),
                   jax.ShapeDtypeStruct((B_pad, D), jnp.float32)),
        compiler_params=pltpu.CompilerParams(
            dimension_semantics=("arbitrary",)),   # time axis carries state
    )


def make_rnn_decoder(params, batch_size):
    """Returns (forward, decode).

    forward(input_data (B,), hidden_state (1,B,D)) -> (log_probs (B,V), hidden_state)
        matches RNNDecoder.forward (single step, original hidden returned).
    decode(tokens (T,B), hidden_state (1,B,D)) -> (log_probs (T,B,V), h_final (1,B,D))
        multi-step path: weights DMA'd once, hidden carried in VMEM scratch.
    """
    prepped = _prep_params(params)
    B = batch_size
    B_pad = ((B + 7) // 8) * 8
    D, V = prepped["D"], prepped["V"]

    w_args = (prepped["w_rz"], prepped["w_in"], prepped["w_hn"],
              prepped["b_rz"], prepped["b_in"], prepped["b_hn"],
              prepped["w_out"], prepped["b_out"])

    call_cache = {1: _make_call(prepped, B, B_pad, T=1)}

    @jax.jit
    def forward(input_data, hidden_state):
        idx = jnp.pad(input_data.astype(jnp.int32), (0, B_pad - B))        # (B_pad,)
        h0 = jnp.pad(hidden_state[0].astype(jnp.float32),
                     ((0, B_pad - B), (0, 0)))                              # (B_pad, D)
        log_probs, _h_new = call_cache[1](idx, prepped["emb"], h0, *w_args)
        # forward() returns the ORIGINAL hidden_state, untouched (per module).
        return log_probs[0, :B, :V], hidden_state

    def decode(tokens, hidden_state):
        T = int(tokens.shape[0])
        if T not in call_cache:
            call_cache[T] = _make_call(prepped, B, B_pad, T=T)
        idx = jnp.pad(tokens.astype(jnp.int32),
                      ((0, 0), (0, B_pad - B))).reshape(-1)                 # (T*B_pad,)
        h0 = jnp.pad(hidden_state[0].astype(jnp.float32),
                     ((0, B_pad - B), (0, 0)))
        lp, h_fin = call_cache[T](idx, prepped["emb"], h0, *w_args)
        return lp[:, :B, :V], h_fin[:B][None]

    return forward, decode


def reference_step(tokens, h, params):
    """Pure-JAX single GRU decode step mirroring the PyTorch module."""
    emb, w_ih, w_hh, b_ih, b_hh, w_out, b_out = params
    D = emb.shape[1]
    x = jnp.maximum(emb[tokens], 0.0)
    gi = x @ w_ih.T + b_ih
    gh = h @ w_hh.T + b_hh
    r = jax.nn.sigmoid(gi[:, :D] + gh[:, :D])
    z = jax.nn.sigmoid(gi[:, D:2 * D] + gh[:, D:2 * D])
    n = jnp.tanh(gi[:, 2 * D:] + r * gh[:, 2 * D:])
    h_new = (1.0 - z) * n + z * h
    logits = h_new @ w_out.T + b_out
    return jax.nn.log_softmax(logits, axis=1), h_new


if __name__ == "__main__":
    # Small, module-consistent shapes: vocab V=32, n_dim D=128, batch B=4, n_layers=1.
    V, D, B = 32, 128, 4

    key = jax.random.PRNGKey(0)
    k = jax.random.split(key, 8)
    scale = 1.0 / jnp.sqrt(jnp.float32(D))

    emb   = jax.random.normal(k[0], (V, D), jnp.float32)                      # nn.Embedding
    w_ih  = jax.random.uniform(k[1], (3 * D, D), jnp.float32, -scale, scale)  # GRU weight_ih_l0
    w_hh  = jax.random.uniform(k[2], (3 * D, D), jnp.float32, -scale, scale)  # GRU weight_hh_l0
    b_ih  = jax.random.uniform(k[3], (3 * D,),   jnp.float32, -scale, scale)  # GRU bias_ih_l0
    b_hh  = jax.random.uniform(k[4], (3 * D,),   jnp.float32, -scale, scale)  # GRU bias_hh_l0
    w_out = jax.random.uniform(k[5], (V, D),     jnp.float32, -scale, scale)  # Linear weight
    b_out = jax.random.uniform(k[6], (V,),       jnp.float32, -scale, scale)  # Linear bias

    input_data = jax.random.randint(k[7], (B,), 0, V, jnp.int32)   # token ids
    hidden_state = jnp.zeros((1, B, D), jnp.float32)               # init_state()

    params = (emb, w_ih, w_hh, b_ih, b_hh, w_out, b_out)
    forward, decode = make_rnn_decoder(params, batch_size=B)

    # --- single-step forward (module semantics) ---
    log_probs, hidden_out = forward(input_data, hidden_state)
    jax.block_until_ready((log_probs, hidden_out))
    assert log_probs.shape == (B, V)
    assert hidden_out.shape == (1, B, D)

    ref_lp, _ = reference_step(input_data, hidden_state[0], params)
    assert jnp.allclose(log_probs, ref_lp, atol=3e-2, rtol=3e-2), \
        float(jnp.max(jnp.abs(log_probs - ref_lp)))
    assert jnp.array_equal(hidden_out, hidden_state)

    # --- multi-step decode (weights VMEM-resident across the grid) ---
    T = 3
    tokens = jax.random.randint(jax.random.PRNGKey(1), (T, B), 0, V, jnp.int32)
    lp_seq, h_fin = decode(tokens, hidden_state)
    jax.block_until_ready((lp_seq, h_fin))
    assert lp_seq.shape == (T, B, V) and h_fin.shape == (1, B, D)

    h_ref = hidden_state[0]
    for t in range(T):
        lp_t, h_ref = reference_step(tokens[t], h_ref, params)
        assert jnp.allclose(lp_seq[t], lp_t, atol=5e-2, rtol=5e-2), \
            (t, float(jnp.max(jnp.abs(lp_seq[t] - lp_t))))
    assert jnp.allclose(h_fin[0], h_ref, atol=5e-2, rtol=5e-2)

    print("KERNEL_OK")
</pallas_src>

<mosaic_0001>
module attributes {stable_mosaic.version = 11 : i64} {
  func.func @_rnn_decoder_kernel(%arg0: i32, %arg1: memref<8xi32, #tpu.memory_space<smem>>, %arg2: memref<32x128xf32, #tpu.memory_space<vmem>>, %arg3: memref<8x128xf32, #tpu.memory_space<vmem>>, %arg4: memref<256x256xbf16, #tpu.memory_space<vmem>>, %arg5: memref<128x128xbf16, #tpu.memory_space<vmem>>, %arg6: memref<128x128xbf16, #tpu.memory_space<vmem>>, %arg7: memref<1x256xf32, #tpu.memory_space<vmem>>, %arg8: memref<1x128xf32, #tpu.memory_space<vmem>>, %arg9: memref<1x128xf32, #tpu.memory_space<vmem>>, %arg10: memref<128x128xbf16, #tpu.memory_space<vmem>>, %arg11: memref<1x128xf32, #tpu.memory_space<vmem>>, %arg12: memref<1x8x128xf32, #tpu.memory_space<vmem>>, %arg13: memref<8x128xf32, #tpu.memory_space<vmem>>, %arg14: memref<8x128xf32, #tpu.memory_space<vmem>>, %arg15: memref<8x128xf32, #tpu.memory_space<vmem>>, %arg16: memref<8x256xbf16, #tpu.memory_space<vmem>>) attributes {dimension_semantics = [#tpu.dimension_semantics<arbitrary>], iteration_bounds = array<i64: 1>, scalar_prefetch = 1 : i64, scratch_operands = 3 : i64, tpu.core_type = #tpu.core_type<tc>, window_params = [{pipeline_mode = #tpu.pipeline_mode<synchronous>, transform_indices = @transform_0, window_bounds = array<i64: 32, 128>}, {pipeline_mode = #tpu.pipeline_mode<synchronous>, transform_indices = @transform_1, window_bounds = array<i64: 8, 128>}, {pipeline_mode = #tpu.pipeline_mode<synchronous>, transform_indices = @transform_2, window_bounds = array<i64: 256, 256>}, {pipeline_mode = #tpu.pipeline_mode<synchronous>, transform_indices = @transform_3, window_bounds = array<i64: 128, 128>}, {pipeline_mode = #tpu.pipeline_mode<synchronous>, transform_indices = @transform_4, window_bounds = array<i64: 128, 128>}, {pipeline_mode = #tpu.pipeline_mode<synchronous>, transform_indices = @transform_5, window_bounds = array<i64: 1, 256>}, {pipeline_mode = #tpu.pipeline_mode<synchronous>, transform_indices = @transform_6, window_bounds = array<i64: 1, 128>}, {pipeline_mode = #tpu.pipeline_mode<synchronous>, transform_indices = @transform_7, window_bounds = array<i64: 1, 128>}, {pipeline_mode = #tpu.pipeline_mode<synchronous>, transform_indices = @transform_8, window_bounds = array<i64: 128, 128>}, {pipeline_mode = #tpu.pipeline_mode<synchronous>, transform_indices = @transform_9, window_bounds = array<i64: 1, 128>}, {transform_indices = @transform_10, window_bounds = array<i64: 1, 8, 128>}, {pipeline_mode = #tpu.pipeline_mode<synchronous>, transform_indices = @transform_11, window_bounds = array<i64: 8, 128>}]} {
    %c0_i32 = arith.constant 0 : i32
    %0 = arith.cmpi eq, %arg0, %c0_i32 : i32
    %1 = arith.extui %0 : i1 to i32
    %c0_i32_0 = arith.constant 0 : i32
    %2 = arith.cmpi ne, %1, %c0_i32_0 : i32
    scf.if %2 {
      %c0_54 = arith.constant 0 : index
      %c0_55 = arith.constant 0 : index
      %99 = vector.load %arg3[%c0_54, %c0_55] : memref<8x128xf32, #tpu.memory_space<vmem>>, vector<8x128xf32>
      %c0_56 = arith.constant 0 : index
      %c0_57 = arith.constant 0 : index
      %100 = vector.load %arg14[%c0_56, %c0_57] : memref<8x128xf32, #tpu.memory_space<vmem>>, vector<8x128xf32>
      tpu.vector_store %arg14[%c0_56, %c0_57], %99 {strides = array<i32>} : memref<8x128xf32, #tpu.memory_space<vmem>>, vector<8x128xf32>,
      %cst_58 = arith.constant 0.000000e+00 : f32
      %101 = vector.broadcast %cst_58 : f32 to vector<8x128xf32>
      %c0_59 = arith.constant 0 : index
      %c0_60 = arith.constant 0 : index
      %102 = vector.load %arg15[%c0_59, %c0_60] : memref<8x128xf32, #tpu.memory_space<vmem>>, vector<8x128xf32>
      tpu.vector_store %arg15[%c0_59, %c0_60], %101 {strides = array<i32>} : memref<8x128xf32, #tpu.memory_space<vmem>>, vector<8x128xf32>,
    } else {
    }
    %c8_i32 = arith.constant 8 : i32
    %3 = arith.muli %arg0, %c8_i32 : i32
    %c0_i32_1 = arith.constant 0 : i32
    %4 = arith.addi %3, %c0_i32_1 : i32
    %5 = arith.index_cast %4 : i32 to index
    %6 = memref.load %arg1[%5] : memref<8xi32, #tpu.memory_space<smem>>
    %7 = arith.index_cast %6 : i32 to index
    %c0 = arith.constant 0 : index
    %8 = vector.load %arg2[%7, %c0] : memref<32x128xf32, #tpu.memory_space<vmem>>, vector<1x128xf32>
    %c0_2 = arith.constant 0 : index
    %c0_3 = arith.constant 0 : index
    %9 = vector.load %arg15[%c0_2, %c0_3] : memref<8x128xf32, #tpu.memory_space<vmem>>, vector<1x128xf32>
    tpu.vector_store %arg15[%c0_2, %c0_3], %8 {strides = array<i32>} : memref<8x128xf32, #tpu.memory_space<vmem>>, vector<1x128xf32>,
    %c8_i32_4 = arith.constant 8 : i32
    %10 = arith.muli %arg0, %c8_i32_4 : i32
    %c1_i32 = arith.constant 1 : i32
    %11 = arith.addi %10, %c1_i32 : i32
    %12 = arith.index_cast %11 : i32 to index
    %13 = memref.load %arg1[%12] : memref<8xi32, #tpu.memory_space<smem>>
    %14 = arith.index_cast %13 : i32 to index
    %c0_5 = arith.constant 0 : index
    %15 = vector.load %arg2[%14, %c0_5] : memref<32x128xf32, #tpu.memory_space<vmem>>, vector<1x128xf32>
    %c1 = arith.constant 1 : index
    %c0_6 = arith.constant 0 : index
    %16 = vector.load %arg15[%c1, %c0_6] : memref<8x128xf32, #tpu.memory_space<vmem>>, vector<1x128xf32>
    tpu.vector_store %arg15[%c1, %c0_6], %15 {strides = array<i32>} : memref<8x128xf32, #tpu.memory_space<vmem>>, vector<1x128xf32>,
    %c8_i32_7 = arith.constant 8 : i32
    %17 = arith.muli %arg0, %c8_i32_7 : i32
    %c2_i32 = arith.constant 2 : i32
    %18 = arith.addi %17, %c2_i32 : i32
    %19 = arith.index_cast %18 : i32 to index
    %20 = memref.load %arg1[%19] : memref<8xi32, #tpu.memory_space<smem>>
    %21 = arith.index_cast %20 : i32 to index
    %c0_8 = arith.constant 0 : index
    %22 = vector.load %arg2[%21, %c0_8] : memref<32x128xf32, #tpu.memory_space<vmem>>, vector<1x128xf32>
    %c2 = arith.constant 2 : index
    %c0_9 = arith.constant 0 : index
    %23 = vector.load %arg15[%c2, %c0_9] : memref<8x128xf32, #tpu.memory_space<vmem>>, vector<1x128xf32>
    tpu.vector_store %arg15[%c2, %c0_9], %22 {strides = array<i32>} : memref<8x128xf32, #tpu.memory_space<vmem>>, vector<1x128xf32>,
    %c8_i32_10 = arith.constant 8 : i32
    %24 = arith.muli %arg0, %c8_i32_10 : i32
    %c3_i32 = arith.constant 3 : i32
    %25 = arith.addi %24, %c3_i32 : i32
    %26 = arith.index_cast %25 : i32 to index
    %27 = memref.load %arg1[%26] : memref<8xi32, #tpu.memory_space<smem>>
    %28 = arith.index_cast %27 : i32 to index
    %c0_11 = arith.constant 0 : index
    %29 = vector.load %arg2[%28, %c0_11] : memref<32x128xf32, #tpu.memory_space<vmem>>, vector<1x128xf32>
    %c3 = arith.constant 3 : index
    %c0_12 = arith.constant 0 : index
    %30 = vector.load %arg15[%c3, %c0_12] : memref<8x128xf32, #tpu.memory_space<vmem>>, vector<1x128xf32>
    tpu.vector_store %arg15[%c3, %c0_12], %29 {strides = array<i32>} : memref<8x128xf32, #tpu.memory_space<vmem>>, vector<1x128xf32>,
    %c0_13 = arith.constant 0 : index
    %c0_14 = arith.constant 0 : index
    %31 = vector.load %arg15[%c0_13, %c0_14] : memref<8x128xf32, #tpu.memory_space<vmem>>, vector<8x128xf32>
    %cst = arith.constant 0.000000e+00 : f32
    %32 = vector.broadcast %cst : f32 to vector<8x128xf32>
    %33 = arith.maximumf %31, %32 : vector<8x128xf32>
    %c0_15 = arith.constant 0 : index
    %c0_16 = arith.constant 0 : index
    %34 = vector.load %arg14[%c0_15, %c0_16] : memref<8x128xf32, #tpu.memory_space<vmem>>, vector<8x128xf32>
    %35 = arith.truncf %33 : vector<8x128xf32> to vector<8x128xbf16>
    %c0_17 = arith.constant 0 : index
    %c0_18 = arith.constant 0 : index
    %36 = vector.load %arg16[%c0_17, %c0_18] : memref<8x256xbf16, #tpu.memory_space<vmem>>, vector<8x128xbf16>
    tpu.vector_store %arg16[%c0_17, %c0_18], %35 {strides = array<i32>} : memref<8x256xbf16, #tpu.memory_space<vmem>>, vector<8x128xbf16>,
    %37 = arith.truncf %34 : vector<8x128xf32> to vector<8x128xbf16>
    %c0_19 = arith.constant 0 : index
    %c128 = arith.constant 128 : index
    %38 = vector.load %arg16[%c0_19, %c128] : memref<8x256xbf16, #tpu.memory_space<vmem>>, vector<8x128xbf16>
    tpu.vector_store %arg16[%c0_19, %c128], %37 {strides = array<i32>} : memref<8x256xbf16, #tpu.memory_space<vmem>>, vector<8x128xbf16>,
    %c0_20 = arith.constant 0 : index
    %c0_21 = arith.constant 0 : index
    %39 = vector.load %arg16[%c0_20, %c0_21] : memref<8x256xbf16, #tpu.memory_space<vmem>>, vector<8x256xbf16>
    %c0_22 = arith.constant 0 : index
    %c0_23 = arith.constant 0 : index
    %40 = vector.load %arg4[%c0_22, %c0_23] : memref<256x256xbf16, #tpu.memory_space<vmem>>, vector<256x256xbf16>
    %cst_24 = arith.constant dense<0.000000e+00> : vector<8x256xf32>
    %41 = tpu.matmul %39, %40, %cst_24 {dimension_numbers = #tpu.dot_dimension_numbers<[1], [0], [0], [1], [0, 0, 1, 1], [], []>} : vector<8x256xbf16>, vector<256x256xbf16>, vector<8x256xf32> -> vector<8x256xf32>
    %c0_25 = arith.constant 0 : index
    %c0_26 = arith.constant 0 : index
    %42 = vector.load %arg7[%c0_25, %c0_26] : memref<1x256xf32, #tpu.memory_space<vmem>>, vector<1x256xf32>
    %43 = vector.broadcast %42 : vector<1x256xf32> to vector<8x256xf32>
    %44 = arith.addf %41, %43 : vector<8x256xf32>
    %45 = vector.extract_strided_slice %44 {offsets = [0, 0], sizes = [8, 128], strides = [1, 1]} : vector<8x256xf32> to vector<8x128xf32>
    %46 = arith.negf %45 : vector<8x128xf32>
    %47 = math.exp %46 : vector<8x128xf32>
    %cst_27 = arith.constant 1.000000e+00 : f32
    %48 = vector.broadcast %cst_27 : f32 to vector<8x128xf32>
    %49 = arith.addf %48, %47 : vector<8x128xf32>
    %50 = arith.divf %48, %49 : vector<8x128xf32>
    %51 = vector.extract_strided_slice %44 {offsets = [0, 128], sizes = [8, 128], strides = [1, 1]} : vector<8x256xf32> to vector<8x128xf32>
    %52 = arith.negf %51 : vector<8x128xf32>
    %53 = math.exp %52 : vector<8x128xf32>
    %cst_28 = arith.constant 1.000000e+00 : f32
    %54 = vector.broadcast %cst_28 : f32 to vector<8x128xf32>
    %55 = arith.addf %54, %53 : vector<8x128xf32>
    %56 = arith.divf %54, %55 : vector<8x128xf32>
    %57 = arith.truncf %33 : vector<8x128xf32> to vector<8x128xbf16>
    %c0_29 = arith.constant 0 : index
    %c0_30 = arith.constant 0 : index
    %58 = vector.load %arg5[%c0_29, %c0_30] : memref<128x128xbf16, #tpu.memory_space<vmem>>, vector<128x128xbf16>
    %cst_31 = arith.constant dense<0.000000e+00> : vector<8x128xf32>
    %59 = tpu.matmul %57, %58, %cst_31 {dimension_numbers = #tpu.dot_dimension_numbers<[1], [0], [0], [1], [0, 0, 1, 1], [], []>} : vector<8x128xbf16>, vector<128x128xbf16>, vector<8x128xf32> -> vector<8x128xf32>
    %c0_32 = arith.constant 0 : index
    %c0_33 = arith.constant 0 : index
    %60 = vector.load %arg8[%c0_32, %c0_33] : memref<1x128xf32, #tpu.memory_space<vmem>>, vector<1x128xf32>
    %61 = vector.broadcast %60 : vector<1x128xf32> to vector<8x128xf32>
    %62 = arith.addf %59, %61 : vector<8x128xf32>
    %63 = arith.truncf %34 : vector<8x128xf32> to vector<8x128xbf16>
    %c0_34 = arith.constant 0 : index
    %c0_35 = arith.constant 0 : index
    %64 = vector.load %arg6[%c0_34, %c0_35] : memref<128x128xbf16, #tpu.memory_space<vmem>>, vector<128x128xbf16>
    %cst_36 = arith.constant dense<0.000000e+00> : vector<8x128xf32>
    %65 = tpu.matmul %63, %64, %cst_36 {dimension_numbers = #tpu.dot_dimension_numbers<[1], [0], [0], [1], [0, 0, 1, 1], [], []>} : vector<8x128xbf16>, vector<128x128xbf16>, vector<8x128xf32> -> vector<8x128xf32>
    %c0_37 = arith.constant 0 : index
    %c0_38 = arith.constant 0 : index
    %66 = vector.load %arg9[%c0_37, %c0_38] : memref<1x128xf32, #tpu.memory_space<vmem>>, vector<1x128xf32>
    %67 = vector.broadcast %66 : vector<1x128xf32> to vector<8x128xf32>
    %68 = arith.addf %65, %67 : vector<8x128xf32>
    %69 = arith.mulf %50, %68 : vector<8x128xf32>
    %70 = arith.addf %62, %69 : vector<8x128xf32>
    %71 = math.tanh %70 : vector<8x128xf32>
    %cst_39 = arith.constant 1.000000e+00 : f32
    %72 = vector.broadcast %cst_39 : f32 to vector<8x128xf32>
    %73 = arith.subf %72, %56 : vector<8x128xf32>
    %74 = arith.mulf %73, %71 : vector<8x128xf32>
    %75 = arith.mulf %56, %34 : vector<8x128xf32>
    %76 = arith.addf %74, %75 : vector<8x128xf32>
    %77 = arith.truncf %76 : vector<8x128xf32> to vector<8x128xbf16>
    %c0_40 = arith.constant 0 : index
    %c0_41 = arith.constant 0 : index
    %78 = vector.load %arg10[%c0_40, %c0_41] : memref<128x128xbf16, #tpu.memory_space<vmem>>, vector<128x128xbf16>
    %cst_42 = arith.constant dense<0.000000e+00> : vector<8x128xf32>
    %79 = tpu.matmul %77, %78, %cst_42 {dimension_numbers = #tpu.dot_dimension_numbers<[1], [0], [0], [1], [0, 0, 1, 1], [], []>} : vector<8x128xbf16>, vector<128x128xbf16>, vector<8x128xf32> -> vector<8x128xf32>
    %c0_43 = arith.constant 0 : index
    %c0_44 = arith.constant 0 : index
    %80 = vector.load %arg11[%c0_43, %c0_44] : memref<1x128xf32, #tpu.memory_space<vmem>>, vector<1x128xf32>
    %81 = vector.broadcast %80 : vector<1x128xf32> to vector<8x128xf32>
    %82 = arith.addf %79, %81 : vector<8x128xf32>
    %cst_45 = arith.constant dense<0xFF800000> : vector<8xf32>
    %83 = vector.multi_reduction <maximumf>, %82, %cst_45 [1] : vector<8x128xf32> to vector<8xf32>
    %84 = vector.shape_cast %83 : vector<8xf32> to vector<8x1xf32>
    %85 = vector.broadcast %84 : vector<8x1xf32> to vector<8x128xf32>
    %86 = arith.subf %82, %85 : vector<8x128xf32>
    %87 = math.exp %86 : vector<8x128xf32>
    %cst_46 = arith.constant dense<0.000000e+00> : vector<8xf32>
    %88 = vector.multi_reduction <add>, %87, %cst_46 [1] : vector<8x128xf32> to vector<8xf32>
    %89 = vector.shape_cast %88 : vector<8xf32> to vector<8x1xf32>
    %90 = math.log %89 : vector<8x1xf32>
    %91 = arith.addf %90, %84 : vector<8x1xf32>
    %92 = vector.broadcast %91 : vector<8x1xf32> to vector<8x128xf32>
    %93 = arith.subf %82, %92 : vector<8x128xf32>
    %c0_47 = arith.constant 0 : index
    %c0_48 = arith.constant 0 : index
    %c0_49 = arith.constant 0 : index
    %94 = vector.load %arg12[%c0_47, %c0_48, %c0_49] : memref<1x8x128xf32, #tpu.memory_space<vmem>>, vector<1x8x128xf32>
    %95 = vector.shape_cast %94 : vector<1x8x128xf32> to vector<8x128xf32>
    %96 = vector.shape_cast %93 : vector<8x128xf32> to vector<1x8x128xf32>
    tpu.vector_store %arg12[%c0_47, %c0_48, %c0_49], %96 {strides = array<i32>} : memref<1x8x128xf32, #tpu.memory_space<vmem>>, vector<1x8x128xf32>,
    %c0_50 = arith.constant 0 : index
    %c0_51 = arith.constant 0 : index
    %97 = vector.load %arg14[%c0_50, %c0_51] : memref<8x128xf32, #tpu.memory_space<vmem>>, vector<8x128xf32>
    tpu.vector_store %arg14[%c0_50, %c0_51], %76 {strides = array<i32>} : memref<8x128xf32, #tpu.memory_space<vmem>>, vector<8x128xf32>,
    %c0_52 = arith.constant 0 : index
    %c0_53 = arith.constant 0 : index
    %98 = vector.load %arg13[%c0_52, %c0_53] : memref<8x128xf32, #tpu.memory_space<vmem>>, vector<8x128xf32>
    tpu.vector_store %arg13[%c0_52, %c0_53], %76 {strides = array<i32>} : memref<8x128xf32, #tpu.memory_space<vmem>>, vector<8x128xf32>,
    return
  }
  func.func @transform_0(%arg0: i32, %arg1: memref<8xi32, #tpu.memory_space<smem>>) -> (i32, i32) {
    %c0_i32 = arith.constant 0 : i32
    %c0_i32_0 = arith.constant 0 : i32
    %c0_i32_1 = arith.constant 0 : i32
    return %c0_i32, %c0_i32_0 : i32, i32
  }
  func.func @transform_1(%arg0: i32, %arg1: memref<8xi32, #tpu.memory_space<smem>>) -> (i32, i32) {
    %c0_i32 = arith.constant 0 : i32
    %c0_i32_0 = arith.constant 0 : i32
    %c0_i32_1 = arith.constant 0 : i32
    return %c0_i32, %c0_i32_0 : i32, i32
  }
  func.func @transform_2(%arg0: i32, %arg1: memref<8xi32, #tpu.memory_space<smem>>) -> (i32, i32) {
    %c0_i32 = arith.constant 0 : i32
    %c0_i32_0 = arith.constant 0 : i32
    %c0_i32_1 = arith.constant 0 : i32
    return %c0_i32, %c0_i32_0 : i32, i32
  }
  func.func @transform_3(%arg0: i32, %arg1: memref<8xi32, #tpu.memory_space<smem>>) -> (i32, i32) {
    %c0_i32 = arith.constant 0 : i32
    %c0_i32_0 = arith.constant 0 : i32
    %c0_i32_1 = arith.constant 0 : i32
    return %c0_i32, %c0_i32_0 : i32, i32
  }
  func.func @transform_4(%arg0: i32, %arg1: memref<8xi32, #tpu.memory_space<smem>>) -> (i32, i32) {
    %c0_i32 = arith.constant 0 : i32
    %c0_i32_0 = arith.constant 0 : i32
    %c0_i32_1 = arith.constant 0 : i32
    return %c0_i32, %c0_i32_0 : i32, i32
  }
  func.func @transform_5(%arg0: i32, %arg1: memref<8xi32, #tpu.memory_space<smem>>) -> (i32, i32) {
    %c0_i32 = arith.constant 0 : i32
    %c0_i32_0 = arith.constant 0 : i32
    %c0_i32_1 = arith.constant 0 : i32
    return %c0_i32, %c0_i32_0 : i32, i32
  }
  func.func @transform_6(%arg0: i32, %arg1: memref<8xi32, #tpu.memory_space<smem>>) -> (i32, i32) {
    %c0_i32 = arith.constant 0 : i32
    %c0_i32_0 = arith.constant 0 : i32
    %c0_i32_1 = arith.constant 0 : i32
    return %c0_i32, %c0_i32_0 : i32, i32
  }
  func.func @transform_7(%arg0: i32, %arg1: memref<8xi32, #tpu.memory_space<smem>>) -> (i32, i32) {
    %c0_i32 = arith.constant 0 : i32
    %c0_i32_0 = arith.constant 0 : i32
    %c0_i32_1 = arith.constant 0 : i32
    return %c0_i32, %c0_i32_0 : i32, i32
  }
  func.func @transform_8(%arg0: i32, %arg1: memref<8xi32, #tpu.memory_space<smem>>) -> (i32, i32) {
    %c0_i32 = arith.constant 0 : i32
    %c0_i32_0 = arith.constant 0 : i32
    %c0_i32_1 = arith.constant 0 : i32
    return %c0_i32, %c0_i32_0 : i32, i32
  }
  func.func @transform_9(%arg0: i32, %arg1: memref<8xi32, #tpu.memory_space<smem>>) -> (i32, i32) {
    %c0_i32 = arith.constant 0 : i32
    %c0_i32_0 = arith.constant 0 : i32
    %c0_i32_1 = arith.constant 0 : i32
    return %c0_i32, %c0_i32_0 : i32, i32
  }
  func.func @transform_10(%arg0: i32, %arg1: memref<8xi32, #tpu.memory_space<smem>>) -> (i32, i32, i32) {
    %c0_i32 = arith.constant 0 : i32
    %c0_i32_0 = arith.constant 0 : i32
    %c0_i32_1 = arith.constant 0 : i32
    return %arg0, %c0_i32, %c0_i32_0 : i32, i32, i32
  }
  func.func @transform_11(%arg0: i32, %arg1: memref<8xi32, #tpu.memory_space<smem>>) -> (i32, i32) {
    %c0_i32 = arith.constant 0 : i32
    %c0_i32_0 = arith.constant 0 : i32
    %c0_i32_1 = arith.constant 0 : i32
    return %c0_i32, %c0_i32_0 : i32, i32
  }
}

</mosaic_0001>

<bundles_post_ra>
// kernel: forward.1
= control target key start
LH: loop header
LB: loop body
LE: loop exit
PB: predicated region body
PF: predicated region fallthrough
CT: control target
= control target key end

     0   :  { %s1344_s0 = inlined_call_operand.vmem [shape: s32[8], index: 0, kind: input, shape index: {}]   ;;  %s1345_s1 = inlined_call_operand.vmem [shape: f32[32,128], index: 1, kind: input, shape index: {}]   ;;  %s1346_s2 = inlined_call_operand.vmem [shape: f32[8,128], index: 2, kind: input, shape index: {}]   ;;  %s1347_s3 = inlined_call_operand.vmem [shape: bf16[256,256], index: 3, kind: input, shape index: {}]   ;;  %s1348_s4 = inlined_call_operand.vmem [shape: bf16[128,128], index: 4, kind: input, shape index: {}]   ;;  %s1349_s5 = inlined_call_operand.vmem [shape: bf16[128,128], index: 5, kind: input, shape index: {}]   ;;  %s1350_s6 = inlined_call_operand.vmem [shape: f32[1,256], index: 6, kind: input, shape index: {}]   ;;  %s1351_s7 = inlined_call_operand.vmem [shape: f32[1,128], index: 7, kind: input, shape index: {}]   ;;  %s1352_s8 = inlined_call_operand.vmem [shape: f32[1,128], index: 8, kind: input, shape index: {}]   ;;  %s1353_s9 = inlined_call_operand.vmem [shape: bf16[128,128], index: 9, kind: input, shape index: {}]   ;;  %s1354_s10 = inlined_call_operand.vmem [shape: f32[1,128], index: 10, kind: input, shape index: {}]   ;;  %s1355_s11 = inlined_call_operand.vmem [shape: f32[1,8,128], index: 11, kind: output, shape index: {0}]   ;;  %s1356_s12 = inlined_call_operand.hbm [shape: f32[8,128], index: 12, kind: output, shape index: {1}]  }
   0x1   :  { %1357 = sst [smem:[#allocation11_spill]] %s1355_s11  ;;  %s18_s23 = sshll.u32 %s1344_s0, 4  ;;  %s19_s23 = int_to_ptr.vmem [resolvable:$true] %s18_s23 }
   0x2   :  { %s972_s24 = scalar_lea.vmem %s19_s23, 16  ;;  %p977_p1 = scmp.lt.s32.totalorder %s19_s23, %s19_s23 }
   0x3   :  { %p973_p0 = scmp.ne.s32.totalorder %s19_s23, %s972_s24  ;;  %p978_p2 = scmp.lt.s32.totalorder %s972_s24, %s972_s24 }
   0x5   :  { %p979_p3 = por %p978_p2, %p977_p1 }
   0x7   :  { %p980_p4 = pnand %p979_p3, %p973_p0 }
   0x9   :  { %983 = shalt.err (!%p980_p4)  }
   0xa   :  { %s1010_s25 = smov [#allocation6]  }
   0xb   :  { %21 = dma.vmem_to_smem %s19_s23, 16, %s1010_s25, [#allocation5] }
   0xc   :  { %1006 = dma.done.wait [#allocation5], 16 }
   0xd   :  { %1007 = vsyncadd [#allocation5], 4294967280 }
   0xe   :  { %23 = sfence }
   0xf   :  { %v886_v0 = vld [vmem:[%s1347_s3 + $0x4] ss:$8 sps:$4 sm:$0xff]   ;;  %v888_v1 = vld [vmem:[%s1347_s3] ss:$8 sps:$4 sm:$0xff]   ;;  %v1011_v2 = vmov 0.0   ;;  %vm1012_vm0 = vmmov 0  }
  0x10   :  { %822 = vmatprep.subr.bf16.mxu1 %v1011_v2  ;;  %52 = vst [vmem:[#allocation3] sm:$0xff] %v1011_v2  ;;  %838 = vmatprep.mubr.msk.bf16.mxu1 %vm1012_vm0, %v1011_v2  ;;  %v889_v3 = vld [vmem:[%s1347_s3 + $0x14] ss:$8 sps:$4 sm:$0xff]   ;;  %v891_v4 = vld [vmem:[%s1347_s3 + $0x10] ss:$8 sps:$4 sm:$0xff]   ;;  %v906_v8 = vld [vmem:[%s1348_s4] sm:$0xff]  }
  0x11   :  { %292 = vmatprep.subr.bf16.mxu0 %v886_v0  ;;  %v892_v5 = vld [vmem:[%s1347_s3 + $0x24] ss:$8 sps:$4 sm:$0xff]   ;;  %v894_v6 = vld [vmem:[%s1347_s3 + $0x20] ss:$8 sps:$4 sm:$0xff]   ;;  %v895_v7 = vld [vmem:[%s1347_s3 + $0x34] ss:$8 sps:$4 sm:$0xff]   ;;  %823 = vmatpush3.bf16.msra.mxu1 %v906_v8 }
  0x12   :  { %293 = vmatpush1.bf16.msra.mxu0 %v888_v1  ;;  %v897_v9 = vld [vmem:[%s1347_s3 + $0x30] ss:$8 sps:$4 sm:$0xff]   ;;  %v898_v10 = vld [vmem:[%s1347_s3 + $0x44] ss:$8 sps:$4 sm:$0xff]   ;;  %824 = vmatprep.subr.bf16.mxu1 %v1011_v2  ;;  %v900_v12 = vld [vmem:[%s1347_s3 + $0x40] ss:$8 sps:$4 sm:$0xff]  }
  0x13   :  { %294 = vmatprep.subr.bf16.mxu0 %v889_v3  ;;  %v910_v11 = vld [vmem:[%s1348_s4 + $0x8] sm:$0xff]   ;;  %s1123_s30 = sld [smem:[#allocation6]]  ;;  %v914_v13 = vld [vmem:[%s1348_s4 + $0x10] sm:$0xff]   ;;  %s1128_s15 = sld [smem:[#allocation6 + $0x1]]  ;;  %v918_v16 = vld [vmem:[%s1348_s4 + $0x18] sm:$0xff]  }
  0x14   :  { %v901_v14 = vld [vmem:[%s1347_s3 + $0x54] ss:$8 sps:$4 sm:$0xff]   ;;  %s1134_s18 = sld [smem:[#allocation6 + $0x2]]  ;;  %s1136_s19 = sld [smem:[#allocation6 + $0x3]]  ;;  %v903_v15 = vld [vmem:[%s1347_s3 + $0x50] ss:$8 sps:$4 sm:$0xff]  }
  0x15   :  { %825 = vmatpush3.bf16.msra.mxu1 %v910_v11  ;;  %v904_v17 = vld [vmem:[%s1347_s3 + $0x64] ss:$8 sps:$4 sm:$0xff]   ;;  %v907_v18 = vld [vmem:[%s1347_s3 + $0x60] ss:$8 sps:$4 sm:$0xff]   ;;  %v908_v20 = vld [vmem:[%s1347_s3 + $0x74] ss:$8 sps:$4 sm:$0xff]  }
  0x16   :  { %295 = vmatpush1.bf16.msra.mxu0 %v891_v4  ;;  %826 = vmatprep.subr.bf16.mxu1 %v1011_v2  ;;  %v922_v19 = vld [vmem:[%s1348_s4 + $0x20] sm:$0xff]   ;;  %v911_v21 = vld [vmem:[%s1347_s3 + $0x70] ss:$8 sps:$4 sm:$0xff]   ;;  %v926_v23 = vld [vmem:[%s1348_s4 + $0x28] sm:$0xff]  }
  0x17   :  { %296 = vmatprep.subr.bf16.mxu0 %v892_v5  ;;  %v912_v22 = vld [vmem:[%s1347_s3 + $0x84] ss:$8 sps:$4 sm:$0xff]   ;;  %v915_v28 = vld [vmem:[%s1347_s3 + $0x80] ss:$8 sps:$4 sm:$0xff]   ;;  %v930_v29 = vld [vmem:[%s1348_s4 + $0x30] sm:$0xff]  }
  0x18   :  { %v916_v30 = vld [vmem:[%s1347_s3 + $0x94] ss:$8 sps:$4 sm:$0xff]   ;;  %v1197_v31 = vld [vmem:[%s1346_s2] sm:$0xff]  ;;  %v919_v32 = vld [vmem:[%s1347_s3 + $0x90] ss:$8 sps:$4 sm:$0xff]  }
  0x19   :  { %827 = vmatpush3.bf16.msra.mxu1 %v914_v13  ;;  %s55_s17 = scalar_lea.vmem %s1345_s1, %s1123_s30  ;;  %s60_s22 = scalar_lea.vmem %s1345_s1, %s1128_s15  ;;  %v1204_v33 = vpack.c.bf16 %v1197_v31, %v1197_v31  ;;  %v920_v34 = vld [vmem:[%s1347_s3 + $0xa4] ss:$8 sps:$4 sm:$0xff]   ;;  %v934_v35 = vld [vmem:[%s1348_s4 + $0x38] sm:$0xff]   ;;  %v923_v38 = vld [vmem:[%s1347_s3 + $0xa0] ss:$8 sps:$4 sm:$0xff]  }
  0x1a   :  { %297 = vmatpush1.bf16.msra.mxu0 %v894_v6  ;;  %828 = vmatprep.subr.bf16.mxu1 %v1011_v2  ;;  %s65_s25 = scalar_lea.vmem %s1345_s1, %s1134_s18  ;;  %s70_s28 = scalar_lea.vmem %s1345_s1, %s1136_s19  ;;  %v56_v24 = vld [vmem:[%s55_s17] sm:$0x1]  ;;  %v924_v39 = vld [vmem:[%s1347_s3 + $0xb4] ss:$8 sps:$4 sm:$0xff]   ;;  %v927_v42 = vld [vmem:[%s1347_s3 + $0xb0] ss:$8 sps:$4 sm:$0xff]  }
  0x1b   :  { %298 = vmatprep.subr.bf16.mxu0 %v895_v7  ;;  %57 = vst [vmem:[#allocation3] sm:$0x1] %v56_v24  ;;  %v61_v25 = vld [vmem:[%s60_s22] sm:$0x1]  ;;  %324 = vmatprep.mubr.bf16.mxu0 %v1204_v33  ;;  %v942_v43 = vld [vmem:[%s1349_s5 + $0x8] sm:$0xff]  }
  0x1c   :  { %v66_v26 = vld [vmem:[%s65_s25] sm:$0x1]  ;;  %62 = vst [vmem:[#allocation3 + $0x1] sm:$0x1] %v61_v25  ;;  %v928_v44 = vld [vmem:[%s1347_s3 + $0xc4] ss:$8 sps:$4 sm:$0xff]  }
  0x1d   :  { %829 = vmatpush3.bf16.msra.mxu1 %v918_v16  ;;  %v71_v27 = vld [vmem:[%s70_s28] sm:$0x1]  ;;  %67 = vst [vmem:[#allocation3 + $0x2] sm:$0x1] %v66_v26 }
  0x1e   :  { %299 = vmatpush1.bf16.msra.mxu0 %v897_v9  ;;  %830 = vmatprep.subr.bf16.mxu1 %v1011_v2  ;;  %72 = vst [vmem:[#allocation3 + $0x3] sm:$0x1] %v71_v27  ;;  %v938_v41 = vld [vmem:[%s1349_s5] sm:$0xff]  }
  0x1f   :  { %300 = vmatprep.subr.bf16.mxu0 %v898_v10 }
  0x21   :  { %831 = vmatpush3.bf16.msra.mxu1 %v922_v19 }
  0x22   :  { %301 = vmatpush1.bf16.msra.mxu0 %v900_v12  ;;  %832 = vmatprep.subr.bf16.mxu1 %v1011_v2 }
  0x23   :  { %302 = vmatprep.subr.bf16.mxu0 %v901_v14 }
  0x25   :  { %833 = vmatpush3.bf16.msra.mxu1 %v926_v23  ;;  %v73_v36 = vld [vmem:[#allocation3] sm:$0xff] }
  0x26   :  { %303 = vmatpush1.bf16.msra.mxu0 %v903_v15  ;;  %834 = vmatprep.subr.bf16.mxu1 %v1011_v2  ;;  %v74_v37 = vmax.f32 %v73_v36, 0.0 }
  0x27   :  { %304 = vmatprep.subr.bf16.mxu0 %v904_v17 }
  0x28   :  { %v76_v40 = vpack.c.bf16 %v74_v37, %v74_v37 }
  0x29   :  { %835 = vmatpush3.bf16.msra.mxu1 %v930_v29 }
  0x2a   :  { %305 = vmatpush1.bf16.msra.mxu0 %v907_v18  ;;  %836 = vmatprep.subr.bf16.mxu1 %v1011_v2 }
  0x2b   :  { %306 = vmatprep.subr.bf16.mxu0 %v908_v20 }
  0x2d   :  { %837 = vmatpush3.bf16.msra.mxu1 %v934_v35 }
  0x2e   :  { %307 = vmatpush1.bf16.msra.mxu0 %v911_v21  ;;  %842 = vmatprep.subr.bf16.mxu1 %v1011_v2 }
  0x2f   :  { %308 = vmatprep.subr.bf16.mxu0 %v912_v22 }
  0x30   :  { %839 = vmatmul.mubr.bf16.vlgmr.msra.gmra.mrb[0].mxu1 %v76_v40 }
  0x31   :  { %843 = vmatpush3.bf16.msra.mxu1 %v938_v41  ;;  %858 = vmatprep.mubr.msk.bf16.mxu1 %vm1012_vm0, %v1011_v2 }
  0x32   :  { %309 = vmatpush1.bf16.msra.mxu0 %v915_v28  ;;  %844 = vmatprep.subr.bf16.mxu1 %v1011_v2 }
  0x33   :  { %310 = vmatprep.subr.bf16.mxu0 %v916_v30 }
  0x36   :  { %311 = vmatpush1.bf16.msra.mxu0 %v919_v32 }
  0x37   :  { %312 = vmatprep.subr.bf16.mxu0 %v920_v34 }
  0x3a   :  { %313 = vmatpush1.bf16.msra.mxu0 %v923_v38 }
  0x3b   :  { %314 = vmatprep.subr.bf16.mxu0 %v924_v39 }
  0x3c   :  { %24 = vsyncpa [#allocation8], 0  ;;  %v931_v45 = vld [vmem:[%s1347_s3 + $0xc0] ss:$8 sps:$4 sm:$0xff]   ;;  %845 = vmatpush3.bf16.msra.mxu1 %v942_v43  ;;  %v944_v46 = vld [vmem:[%s1349_s5 + $0x10] sm:$0xff]   ;;  %v115_v7 = vlaneseq }
  0x3d   :  { %v932_v47 = vld [vmem:[%s1347_s3 + $0xd4] ss:$8 sps:$4 sm:$0xff]   ;;  %846 = vmatprep.subr.bf16.mxu1 %v1011_v2  ;;  %v935_v48 = vld [vmem:[%s1347_s3 + $0xd0] ss:$8 sps:$4 sm:$0xff]   ;;  %v936_v50 = vld [vmem:[%s1347_s3 + $0xe4] ss:$8 sps:$4 sm:$0xff]  }
  0x3e   :  { %315 = vmatpush1.bf16.msra.mxu0 %v927_v42  ;;  %v945_v49 = vld [vmem:[%s1349_s5 + $0x18] sm:$0xff]   ;;  %v939_v51 = vld [vmem:[%s1347_s3 + $0xe0] ss:$8 sps:$4 sm:$0xff]   ;;  %v948_v56 = vld [vmem:[%s1349_s5 + $0x30] sm:$0xff]   ;;  %v116_v8 = vshrl.u32 %v115_v7, 7 }
  0x3f   :  { %316 = vmatprep.subr.bf16.mxu0 %v928_v44  ;;  %v946_v52 = vld [vmem:[%s1349_s5 + $0x20] sm:$0xff]   ;;  %v940_v53 = vld [vmem:[%s1347_s3 + $0xf4] ss:$8 sps:$4 sm:$0xff]   ;;  %v943_v54 = vld [vmem:[%s1347_s3 + $0xf0] ss:$8 sps:$4 sm:$0xff]  }
  0x40   :  { %847 = vmatpush3.bf16.msra.mxu1 %v944_v46  ;;  %v947_v55 = vld [vmem:[%s1349_s5 + $0x28] sm:$0xff]   ;;  %v949_v57 = vld [vmem:[%s1349_s5 + $0x38] sm:$0xff]   ;;  %v950_v58 = vld [vmem:[%s1353_s9] sm:$0xff]   ;;  %v117_v9 = vsub.s32 0, %v116_v8  ;;  %v121_v11 = vsub.s32 1, %v116_v8 }
  0x41   :  { %848 = vmatprep.subr.bf16.mxu1 %v1011_v2  ;;  %v951_v59 = vld [vmem:[%s1353_s9 + $0x8] sm:$0xff]   ;;  %v952_v60 = vld [vmem:[%s1353_s9 + $0x10] sm:$0xff]   ;;  %v953_v61 = vld [vmem:[%s1353_s9 + $0x18] sm:$0xff]  }
  0x42   :  { %317 = vmatpush1.bf16.msra.mxu0 %v931_v45  ;;  %v954_v62 = vld [vmem:[%s1353_s9 + $0x20] sm:$0xff]   ;;  %v955_v63 = vld [vmem:[%s1353_s9 + $0x28] sm:$0xff]   ;;  %v956_v0 = vld [vmem:[%s1353_s9 + $0x30] sm:$0xff]  }
  0x43   :  { %318 = vmatprep.subr.bf16.mxu0 %v932_v47  ;;  %v957_v1 = vld [vmem:[%s1353_s9 + $0x38] sm:$0xff]   ;;  %v113_v10 = vld [vmem:[%s1350_s6] sm:$0x3] }
  0x44   :  { %849 = vmatpush3.bf16.msra.mxu1 %v945_v49  ;;  %v118_v12 = vrot.slane %v113_v10, %v117_v9  ;;  %v122_v14 = vrot.slane %v113_v10, %v121_v11  ;;  %v770_v28 = vld [vmem:[%s1352_s8] ss:$0 sm:$0xff] }
  0x45   :  { %850 = vmatprep.subr.bf16.mxu1 %v1011_v2  ;;  %v761_v32 = vld [vmem:[%s1351_s7] ss:$0 sm:$0xff]  ;;  %s1013_s7 = smov [#allocation7]  }
  0x46   :  { %319 = vmatpush1.bf16.msra.mxu0 %v935_v48  ;;  %v779_v44 = vld [vmem:[%s1354_s10] ss:$0 sm:$0xff]  ;;  %s708_s18 = sshll.u32 %s1013_s7, 4  ;;  %s709_s18 = int_to_ptr.vmem [resolvable:$true] %s708_s18 }
  0x47   :  { %320 = vmatprep.subr.bf16.mxu0 %v936_v50  ;;  %s984_s19 = scalar_lea.vmem %s709_s18, 128  ;;  %p989_p6 = scmp.lt.s32.totalorder %s709_s18, %s709_s18 }
  0x48   :  { %851 = vmatpush3.bf16.msra.mxu1 %v946_v52  ;;  %p985_p5 = scmp.ne.s32.totalorder %s709_s18, %s984_s19  ;;  %p990_p7 = scmp.lt.s32.totalorder %s984_s19, %s984_s19 }
  0x49   :  { %852 = vmatprep.subr.bf16.mxu1 %v1011_v2 }
  0x4a   :  { %321 = vmatpush1.bf16.msra.mxu0 %v939_v51  ;;  %p991_p8 = por %p990_p7, %p989_p6 }
  0x4b   :  { %322 = vmatprep.subr.bf16.mxu0 %v940_v53 }
  0x4c   :  { %853 = vmatpush3.bf16.msra.mxu1 %v947_v55  ;;  %p992_p9 = pnand %p991_p8, %p985_p5 }
  0x4d   :  { %854 = vmatprep.subr.bf16.mxu1 %v1011_v2 }
  0x4e   :  { %323 = vmatpush1.bf16.msra.mxu0 %v943_v54 }
  0x4f   :  { %862 = vmatprep.subr.bf16.mxu0 %v1011_v2 }
  0x50   :  { %855 = vmatpush3.bf16.msra.mxu1 %v948_v56 }
  0x51   :  { %325 = vmatmul.mubr.bf16.vlgmr.msra.gmra.mrb[0].mxu0 %v76_v40  ;;  %856 = vmatprep.subr.bf16.mxu1 %v1011_v2 }
  0x52   :  { %878 = vmatprep.mubr.msk.bf16.mxu0 %vm1012_vm0, %v1011_v2  ;;  %863 = vmatpush3.bf16.msra.mxu0 %v950_v58 }
  0x53   :  { %864 = vmatprep.subr.bf16.mxu0 %v1011_v2 }
  0x54   :  { %857 = vmatpush3.bf16.msra.mxu1 %v949_v57 }
  0x56   :  { %865 = vmatpush3.bf16.msra.mxu0 %v951_v59 }
  0x57   :  { %859 = vmatmul.mubr.bf16.vlgmr.msra.gmra.mrb[4].mxu1 %v1204_v33  ;;  %866 = vmatprep.subr.bf16.mxu0 %v1011_v2 }
  0x5a   :  { %867 = vmatpush3.bf16.msra.mxu0 %v952_v60 }
  0x5b   :  { %868 = vmatprep.subr.bf16.mxu0 %v1011_v2 }
  0x5e   :  { %869 = vmatpush3.bf16.msra.mxu0 %v953_v61 }
  0x5f   :  { %870 = vmatprep.subr.bf16.mxu0 %v1011_v2 }
  0x62   :  { %871 = vmatpush3.bf16.msra.mxu0 %v954_v62 }
  0x63   :  { %872 = vmatprep.subr.bf16.mxu0 %v1011_v2 }
  0x66   :  { %873 = vmatpush3.bf16.msra.mxu0 %v955_v63 }
  0x67   :  { %874 = vmatprep.subr.bf16.mxu0 %v1011_v2 }
  0x6a   :  { %875 = vmatpush3.bf16.msra.mxu0 %v956_v0 }
  0x6b   :  { %876 = vmatprep.subr.bf16.mxu0 %v1011_v2 }
  0x6e   :  { %877 = vmatpush3.bf16.msra.mxu0 %v957_v1 }
 0x103   :  { %v450_v3 = vpop.f32.mrb[0].mxu1 }
 0x104   :  { %v840_v4 = vpop.f32.mrb[1].mxu1  ;;  %v451_v34 = vadd.f32 %v761_v32, %v450_v3 }
 0x105   :  { %v453_v5 = vpop.f32.mrb[2].mxu1 }
 0x106   :  { %v841_v6 = vpop.f32.mrb[3].mxu1 }
 0x124   :  { %v326_v13 = vpop.f32.mrb[0].mxu0 }
 0x125   :  { %v327_v15 = vadd.f32 %v326_v13, %v118_v12  ;;  %v328_v16 = vpop.f32.mrb[1].mxu0 }
 0x126   :  { %v330_v17 = vpop.f32.mrb[2].mxu0  ;;  %v329_v19 = vadd.f32 %v328_v16, %v122_v14 }
 0x127   :  { %v759_v2 = vmul.f32 -1.442695, %v327_v15  ;;  %v331_v18 = vpop.f32.mrb[3].mxu0 }
 0x128   :  { %v760_v20 = vmul.f32 -1.442695, %v329_v19 }
 0x129   :  { %958 = vpow2.f32 %v759_v2 }
 0x12a   :  { %v561_v21 = vpop.f32.mrb[4].mxu1  ;;  %960 = vpow2.f32 %v760_v20 }
 0x12b   :  { %v860_v22 = vpop.f32.mrb[5].mxu1  ;;  %v562_v30 = vadd.f32 %v770_v28, %v561_v21 }
 0x12c   :  { %v564_v23 = vpop.f32.mrb[6].mxu1 }
 0x12d   :  { %v861_v24 = vpop.f32.mrb[7].mxu1 }
 0x133   :  { %v959_v25 = vpop.eup %958 }
 0x134   :  { %v336_v26 = vadd.f32 1.0, %v959_v25  ;;  %v961_v27 = vpop.eup %960 }
 0x135   :  { %v342_v29 = vadd.f32 1.0, %v961_v27 }
 0x136   :  { %962 = vrcp.f32 %v336_v26 }
 0x137   :  { %964 = vrcp.f32 %v342_v29 }
 0x140   :  { %v963_v33 = vpop.eup %962 }
 0x141   :  { %v567_v35 = vmul.f32 %v963_v33, %v562_v30  ;;  %v965_v37 = vpop.eup %964 }
 0x142   :  { %v570_v38 = vsub.f32 1.0, %v965_v37  ;;  %v572_v41 = vmul.f32 %v965_v37, %v1197_v31 }
 0x143   :  { %v568_v36 = vadd.f32 %v567_v35, %v451_v34 }
 0x145   :  { %966 = vtanh.f32 %v568_v36 }
 0x14f   :  { %v967_v39 = vpop.eup %966 }
 0x150   :  { %v571_v40 = vmul.f32 %v967_v39, %v570_v38 }
 0x152   :  { %v573_v42 = vadd.f32 %v572_v41, %v571_v40 }
 0x154   :  { %v574_v43 = vpack.c.bf16 %v573_v42, %v573_v42  ;;  %699 = vst [vmem:[#allocation7] sm:$0xff] %v573_v42 }
 0x156   :  { %879 = vmatmul.mubr.bf16.vlgmr.msra.gmra.mrb[4].mxu0 %v574_v43 }
 0x229   :  { %v680_v45 = vpop.f32.mrb[4].mxu0 }
 0x22a   :  { %v681_v46 = vadd.f32 %v779_v44, %v680_v45  ;;  %v880_v47 = vpop.f32.mrb[5].mxu0 }
 0x22b   :  { %v683_v48 = vpop.f32.mrb[6].mxu0 }
 0x22c   :  { %686 = vmax.xlane.f32.xlu0 %v681_v46  ;;  %v881_v49 = vpop.f32.mrb[7].mxu0 }
 0x2b9   :  { %v687_v50 = vpop.xlane.xlu0 %686 }
 0x2ba   :  { %v688_v51 = vsub.f32 %v681_v46, %v687_v50 }
 0x2bc   :  { %v689_v52 = vmul.f32 1.442695, %v688_v51 }
 0x2be   :  { %968 = vpow2.f32 %v689_v52 }
 0x2c8   :  { %v969_v53 = vpop.eup %968 }
 0x2c9   :  { %691 = vadd.xlane.f32.xlu0 %v969_v53 }
 0x2ca   :  { %995 = shalt.err (!%p992_p9)
}
 0x2cb   :  { %s996_s14 = scalar_lea.hbm %s1356_s12, 128 }
 0x2cc   :  { %p997_p10 = scmp.ne.s32.totalorder %s1356_s12, %s996_s14  ;;  %p1000_p11 = scmp.lt.u32.totalorder %s996_s14, %s1356_s12 }
 0x2ce   :  { %p1002_p12 = pnand %p1000_p11, %p997_p10 }
 0x2d0   :  { %1005 = shalt.err (!%p1002_p12)
}
 0x2d1   :  { %711 = dma.vmem_to_hbm [thread:$0]  %s709_s18, 128, %s1356_s12, [#allocation8]  }
 0x2d2   :  { %s1358_s25 = sld [smem:[#allocation11_spill]] }
 0x356   :  { %v692_v31 = vpop.xlane.xlu0 %691 }
 0x357   :  { %970 = vlog2.f32 %v692_v31 }
 0x361   :  { %v971_v54 = vpop.eup %970 }
 0x362   :  { %v694_v55 = vmul.f32 0.6931472, %v971_v54 }
 0x364   :  { %v695_v56 = vadd.f32 %v694_v55, %v687_v50 }
 0x366   :  { %v696_v57 = vsub.f32 %v681_v46, %v695_v56 }
 0x368   :  { %697 = vst [vmem:[%s1358_s25] sm:$0xff] %v696_v57 }
 0x369   :  { %1008 = dma.done.wait [#allocation8], 128  }
 0x36a   :  { %1009 = vsyncadd [#allocation8], 4294967168 }
 0x36b   :  { %717 = vsyncpa [#allocation8], 1 }

</bundles_post_ra>
